<compile_context>
chip_gen: v7x
topology: tpu7x:2x2x1
jax: 0.10.0
libtpu: 0.0.40
codegen_flags: <defaults>
</compile_context>

<pallas_src>
import functools

import jax
import jax.numpy as jnp
from jax import lax
from jax.experimental import pallas as pl
from jax.experimental.pallas import tpu as pltpu

EPS = 1e-5


# ----------------------------- in-kernel helpers -----------------------------
def _lane_group_sums(s, group):
    """Cyclic roll-tree: each lane l gets the sum of all lanes with the same
    (l % group).  Per-channel totals end up replicated per lane, so no
    reshape / relayout is needed.  Requires last_dim / group to be a power of 2."""
    width = s.shape[-1]
    shift = group
    while shift < width:
        s = s + pltpu.roll(s, shift, axis=1)
        shift *= 2
    return s


def _fold_bn_lanes(st_sum, st_sumsq, gamma_lane, beta_lane, count):
    """Training-mode BN folded into a per-lane FMA: y * scale + shift."""
    mean = st_sum / count
    var = jnp.maximum(st_sumsq / count - mean * mean, 0.0)  # clamp E[x^2]-m^2
    scale = gamma_lane * lax.rsqrt(var + EPS)
    shift = beta_lane - mean * scale
    return scale, shift


def _shift_rows(rows, H):
    """(H, K) -> previous-row / next-row views with zero fill (conv pad=1)."""
    zero = jnp.zeros((1, rows.shape[-1]), rows.dtype)
    up = jnp.concatenate([zero, rows[:H - 1]], axis=0)   # row h-1
    dn = jnp.concatenate([rows[1:], zero], axis=0)       # row h+1
    return up, dn


def _toeplitz_matmul(rows_bf, t_ref, H):
    """3x3 / stride-1 / pad-1 conv as 3 accumulate-matmuls (bf16 -> f32 acc)."""
    up, dn = _shift_rows(rows_bf, H)
    return (jnp.dot(up, t_ref[0], preferred_element_type=jnp.float32)
            + jnp.dot(rows_bf, t_ref[1], preferred_element_type=jnp.float32)
            + jnp.dot(dn, t_ref[2], preferred_element_type=jnp.float32))


# --------------------------------- kernels -----------------------------------
def _conv1_kernel(H, W, Cin, Cout, use_proj,
                  x_ref, t1_ref, tsc_ref, y1_ref, ysc_ref, st_ref):
    """conv1 + (1x1 shortcut conv / identity reorder) + per-lane partial stats."""
    x = x_ref[0]                                            # (Cin, H, W) f32 NCHW block
    # NCHW -> (H, Cin*W) matmul rows with NO transpose: static channel slices
    # concatenated along lanes; the Toeplitz K-ordering matches this layout.
    xrow = jnp.concatenate([x[ci] for ci in range(Cin)], axis=-1)
    xrow_bf = xrow.astype(jnp.bfloat16)

    y1 = _toeplitz_matmul(xrow_bf, t1_ref, H)               # (H, W*Cout) f32
    y1_bf = y1.astype(jnp.bfloat16)
    y1_ref[...] = y1_bf                                     # lane-dense bf16 store

    sc = jnp.dot(xrow_bf, tsc_ref[...], preferred_element_type=jnp.float32)
    sc_bf = sc.astype(jnp.bfloat16)
    ysc_ref[...] = sc_bf                                    # shortcut, (w, c) lane order

    # Per-lane partial stats (pure sublane reduction); the W-group collapse is
    # deferred to the consumer's roll-tree.  Stats use the stored bf16 values.
    y1f = y1_bf.astype(jnp.float32)
    stats = [jnp.sum(y1f, axis=0, keepdims=True),
             jnp.sum(y1f * y1f, axis=0, keepdims=True)]
    if use_proj:
        scf = sc_bf.astype(jnp.float32)
        stats += [jnp.sum(scf, axis=0, keepdims=True),
                  jnp.sum(scf * scf, axis=0, keepdims=True)]
    st_ref[...] = jnp.concatenate(stats, axis=0).reshape(1, len(stats), W * Cout)


def _conv2_kernel(H, W, Cout, count,
                  st1_ref, g1b1_ref, y1_ref, t2_ref, y2_ref, st2_ref):
    """BN1 (global batch stats, folded FMA) + ReLU + conv2 + per-lane stats."""
    WC = W * Cout
    st1 = st1_ref[...]                                      # (N, ns1, WC) f32 (tiny)
    gb = g1b1_ref[...]                                      # (2, WC)
    tot = _lane_group_sums(jnp.sum(st1[:, 0:2, :], axis=0), Cout)
    a1, b1 = _fold_bn_lanes(tot[0:1], tot[1:2], gb[0:1], gb[1:2], count)

    h1 = jnp.maximum(y1_ref[...].astype(jnp.float32) * a1 + b1, 0.0)
    h1_bf = h1.astype(jnp.bfloat16)
    y2 = _toeplitz_matmul(h1_bf, t2_ref, H)                 # (H, WC) f32
    y2_ref[...] = y2
    st2_ref[...] = jnp.concatenate(
        [jnp.sum(y2, axis=0, keepdims=True),
         jnp.sum(y2 * y2, axis=0, keepdims=True)], axis=0).reshape(1, 2, WC)


def _out_kernel(Cout, count, use_proj, *refs):
    """BN2 + (shortcut BN) + residual add + ReLU, all lane-dense FMAs."""
    if use_proj:
        st1_ref, st2_ref, g2b2_ref, gscbsc_ref, y2_ref, ysc_ref, out_ref = refs
    else:
        st2_ref, g2b2_ref, y2_ref, ysc_ref, out_ref = refs

    st2 = _lane_group_sums(jnp.sum(st2_ref[...], axis=0), Cout)
    gb2 = g2b2_ref[...]
    a2, b2 = _fold_bn_lanes(st2[0:1], st2[1:2], gb2[0:1], gb2[1:2], count)
    bn2 = y2_ref[...] * a2 + b2

    sc = ysc_ref[...].astype(jnp.float32)
    if use_proj:
        stsc = _lane_group_sums(jnp.sum(st1_ref[...][:, 2:4, :], axis=0), Cout)
        gbs = gscbsc_ref[...]
        asc, bsc = _fold_bn_lanes(stsc[0:1], stsc[1:2], gbs[0:1], gbs[1:2], count)
        sc = sc * asc + bsc
    out_ref[...] = jnp.maximum(bn2 + sc, 0.0)


# ------------------------- wrapper-side operator builds -----------------------
def _toeplitz_3x3(w_oihw, W, k_order):
    """3x3 conv as a block-Toeplitz matmul operator: (3, Cin*W, W*Cout) bf16.

    One (K, W*Cout) matrix per vertical tap (kh = 0,1,2 -> input row h-1,h,h+1).
    K ordering "cw" -> ci*W + wi (channel-major, matches pass-1 NCHW channel
    concat); "wc" -> wi*Cin + ci (lane order of a previous conv's output).
    """
    Cout, Cin = w_oihw.shape[0], w_oihw.shape[1]
    wi = jnp.arange(W)[:, None]
    wo = jnp.arange(W)[None, :]
    dw = wi - wo + 1                                        # kw index
    mask = ((dw >= 0) & (dw <= 2)).astype(w_oihw.dtype)     # zero pad along W
    dwc = jnp.clip(dw, 0, 2)
    kt = jnp.transpose(w_oihw, (2, 1, 3, 0))                # (kh, ci, kw, co)
    taps = kt[:, :, dwc, :] * mask[None, None, :, :, None]  # (kh, ci, wi, wo, co)
    if k_order == "wc":
        taps = jnp.transpose(taps, (0, 2, 1, 3, 4))         # (kh, wi, ci, wo, co)
    return taps.reshape(3, Cin * W, W * Cout).astype(jnp.bfloat16)


def _blockdiag_1x1(w_oi, W):
    """1x1 conv (or identity reorder) as a (Cin*W, W*Cout) block-diag operator."""
    eye = jnp.eye(W, dtype=w_oi.dtype)
    t = w_oi.T[:, None, None, :] * eye[None, :, :, None]    # (ci, wi, wo, co)
    Cin, Cout = w_oi.shape[1], w_oi.shape[0]
    return t.reshape(Cin * W, W * Cout).astype(jnp.bfloat16)


def _lane_tile(v, W):
    """(Cout,) per-channel vector -> (1, W*Cout) per-lane vector ((w, c) order)."""
    return jnp.tile(v.astype(jnp.float32), W).reshape(1, -1)


# ---------------------------------- wrapper -----------------------------------
def resblock_forward(x_nchw, params, stride=1):
    """ResBlock forward. x_nchw: (N, Cin, H, W) f32 -> (N, Cout, H, W) f32."""
    assert stride == 1, "stride != 1 not implemented"  # TODO(synk): strided conv
    N, Cin, H, W = x_nchw.shape
    Cout = params["w1"].shape[0]
    WC = W * Cout
    use_proj = (Cin != Cout)
    ns1 = 4 if use_proj else 2
    cnt = float(N * H * W)
    assert W & (W - 1) == 0, "W must be a power of two (lane roll-tree)"
    assert H % 8 == 0, "H must be a multiple of 8 (sublane tiling)"

    x = x_nchw.astype(jnp.float32)

    # Parameter-only operator builds (no serial dependency between passes).
    t1 = _toeplitz_3x3(params["w1"], W, "cw")               # (3, Cin*W, WC)
    t2 = _toeplitz_3x3(params["w2"], W, "wc")               # (3, WC, WC)
    if use_proj:
        tsc = _blockdiag_1x1(params["wsc"][:, :, 0, 0], W)
    else:
        tsc = _blockdiag_1x1(jnp.eye(Cout, dtype=jnp.float32), W)  # x -> (w,c) order
    g1b1 = jnp.concatenate([_lane_tile(params["g1"], W),
                            _lane_tile(params["b1"], W)], axis=0)
    g2b2 = jnp.concatenate([_lane_tile(params["g2"], W),
                            _lane_tile(params["b2"], W)], axis=0)
    gscbsc = (jnp.concatenate([_lane_tile(params["gsc"], W),
                               _lane_tile(params["bsc"], W)], axis=0)
              if use_proj else None)

    cparams = pltpu.CompilerParams(
        # One image per step keeps >= 2 "parallel" steps for the v7x megacore.
        dimension_semantics=("parallel",),
        # Tiny blocks here; at real sizes keep <= ~48 MiB on v7x (64 MiB VMEM),
        # raise towards 64-96 MiB on v5e/v6e (128 MiB VMEM).
        vmem_limit_bytes=32 * 1024 * 1024,
    )

    def full(shape):
        return pl.BlockSpec(shape, lambda n: (0,) * len(shape))

    row_spec = pl.BlockSpec((H, WC), lambda n: (n, 0))       # lane-dense rows
    x_spec = pl.BlockSpec((1, Cin, H, W), lambda n: (n, 0, 0, 0))
    st1_spec = pl.BlockSpec((1, ns1, WC), lambda n: (n, 0, 0))
    st2_spec = pl.BlockSpec((1, 2, WC), lambda n: (n, 0, 0))

    # ---- pass 1: conv1 + shortcut (bf16, lane-dense) + per-lane stats -------
    y1, ysc, st1 = pl.pallas_call(
        functools.partial(_conv1_kernel, H, W, Cin, Cout, use_proj),
        grid=(N,),
        in_specs=[x_spec, full((3, Cin * W, WC)), full((Cin * W, WC))],
        out_specs=[row_spec, row_spec, st1_spec],
        out_shape=[jax.ShapeDtypeStruct((N * H, WC), jnp.bfloat16),
                   jax.ShapeDtypeStruct((N * H, WC), jnp.bfloat16),
                   jax.ShapeDtypeStruct((N, ns1, WC), jnp.float32)],
        compiler_params=cparams,
    )(x, t1, tsc)

    # ---- pass 2: BN1+ReLU (folded in-kernel from st1) + conv2 + stats -------
    y2, st2 = pl.pallas_call(
        functools.partial(_conv2_kernel, H, W, Cout, cnt),
        grid=(N,),
        in_specs=[full((N, ns1, WC)), full((2, WC)), row_spec, full((3, WC, WC))],
        out_specs=[row_spec, st2_spec],
        out_shape=[jax.ShapeDtypeStruct((N * H, WC), jnp.float32),
                   jax.ShapeDtypeStruct((N, 2, WC), jnp.float32)],
        compiler_params=cparams,
    )(st1, g1b1, y1, t2)

    # ---- pass 3: BN2 + shortcut(-BN) + residual add + ReLU ------------------
    if use_proj:
        in_specs3 = [full((N, ns1, WC)), full((N, 2, WC)), full((2, WC)),
                     full((2, WC)), row_spec, row_spec]
        inputs3 = (st1, st2, g2b2, gscbsc, y2, ysc)
    else:
        in_specs3 = [full((N, 2, WC)), full((2, WC)), row_spec, row_spec]
        inputs3 = (st2, g2b2, y2, ysc)
    out2d = pl.pallas_call(
        functools.partial(_out_kernel, Cout, cnt, use_proj),
        grid=(N,),
        in_specs=in_specs3,
        out_specs=row_spec,
        out_shape=jax.ShapeDtypeStruct((N * H, WC), jnp.float32),
        compiler_params=cparams,
    )(*inputs3)

    # TODO(synk): fold this relayout into pass 3 (or keep NHWC end-to-end).
    return jnp.transpose(out2d.reshape(N, H, W, Cout), (0, 3, 1, 2))


# ---------------- pure-JAX reference (for correctness checks) ----------------
def _conv_ref(x, w, pad):
    return lax.conv_general_dilated(
        x, w, window_strides=(1, 1), padding=((pad, pad), (pad, pad)),
        dimension_numbers=("NCHW", "OIHW", "NCHW"),
        precision=lax.Precision.HIGHEST)


def _bn_ref(x, g, b):
    mean = jnp.mean(x, axis=(0, 2, 3), keepdims=True)
    var = jnp.mean((x - mean) ** 2, axis=(0, 2, 3), keepdims=True)
    return (x - mean) * lax.rsqrt(var + EPS) * g.reshape(1, -1, 1, 1) + b.reshape(1, -1, 1, 1)


def resblock_ref(x, params, rounding="f32"):
    """Spec reference.  rounding="kernel" applies bf16 rounding at the same
    points as the kernel (conv matmul operands and the stored conv1/shortcut
    intermediates); "f32" is the pure f32 spec."""
    if rounding == "kernel":
        q = lambda t: t.astype(jnp.bfloat16).astype(jnp.float32)
    else:
        q = lambda t: t
    Cin = x.shape[1]
    Cout = params["w1"].shape[0]
    y1 = q(_conv_ref(q(x), q(params["w1"]), 1))
    h1 = jnp.maximum(_bn_ref(y1, params["g1"], params["b1"]), 0.0)
    out = _bn_ref(_conv_ref(q(h1), q(params["w2"]), 1), params["g2"], params["b2"])
    if Cin != Cout:
        sc = _bn_ref(q(_conv_ref(q(x), q(params["wsc"]), 0)),
                     params["gsc"], params["bsc"])
    else:
        sc = q(x)                       # kernel stores the identity shortcut as bf16
    return jnp.maximum(out + sc, 0.0)


# ----------------------------------- main -------------------------------------
def _make_params(key, Cin, Cout):
    ks = jax.random.split(key, 9)
    return {
        "w1": 0.1 * jax.random.normal(ks[0], (Cout, Cin, 3, 3), jnp.float32),
        "w2": 0.1 * jax.random.normal(ks[1], (Cout, Cout, 3, 3), jnp.float32),
        "wsc": 0.1 * jax.random.normal(ks[2], (Cout, Cin, 1, 1), jnp.float32),
        "g1": 1.0 + 0.1 * jax.random.normal(ks[3], (Cout,), jnp.float32),
        "b1": 0.1 * jax.random.normal(ks[4], (Cout,), jnp.float32),
        "g2": 1.0 + 0.1 * jax.random.normal(ks[5], (Cout,), jnp.float32),
        "b2": 0.1 * jax.random.normal(ks[6], (Cout,), jnp.float32),
        "gsc": 1.0 + 0.1 * jax.random.normal(ks[7], (Cout,), jnp.float32),
        "bsc": 0.1 * jax.random.normal(ks[8], (Cout,), jnp.float32),
    }


def _run_case(key, N, Cin, Cout, H, W):
    kp, kx = jax.random.split(key)
    params = _make_params(kp, Cin, Cout)
    x = jax.random.normal(kx, (N, Cin, H, W), jnp.float32)

    out = jax.block_until_ready(resblock_forward(x, params))
    assert out.shape == (N, Cout, H, W), out.shape

    # Tight check vs a reference with bf16 rounding at the kernel's rounding
    # points (matmul operands + stored conv1/shortcut intermediates).
    ref_q = resblock_ref(x, params, rounding="kernel")
    err_q = float(jnp.max(jnp.abs(out - ref_q)))
    assert err_q < 2e-2, f"max abs error vs rounding-matched reference: {err_q}"

    # Loose sanity check vs the pure-f32 spec (tolerance dominated by bf16
    # MXU operands and bf16-stored intermediates, not by the algorithm).
    ref_f = resblock_ref(x, params, rounding="f32")
    err_f = float(jnp.max(jnp.abs(out - ref_f)))
    assert err_f < 1e-1, f"max abs error vs f32 reference: {err_f}"


if __name__ == "__main__":
    key = jax.random.PRNGKey(0)
    k1, k2 = jax.random.split(key)
    _run_case(k1, N=2, Cin=4, Cout=8, H=16, W=16)   # projection shortcut (1x1 conv + BN)
    _run_case(k2, N=2, Cin=8, Cout=8, H=16, W=16)   # identity shortcut
    print("KERNEL_OK")
</pallas_src>

<mosaic_0001>
module attributes {stable_mosaic.version = 11 : i64} {
  func.func @_conv1_kernel(%arg0: i32, %arg1: memref<1x4x16x16xf32, #tpu.memory_space<vmem>>, %arg2: memref<3x64x128xbf16, #tpu.memory_space<vmem>>, %arg3: memref<64x128xbf16, #tpu.memory_space<vmem>>, %arg4: memref<16x128xbf16, #tpu.memory_space<vmem>>, %arg5: memref<16x128xbf16, #tpu.memory_space<vmem>>, %arg6: memref<1x4x128xf32, #tpu.memory_space<vmem>>) attributes {dimension_semantics = [#tpu.dimension_semantics<parallel>], iteration_bounds = array<i64: 2>, scalar_prefetch = 0 : i64, scratch_operands = 0 : i64, tpu.core_type = #tpu.core_type<tc>, window_params = [{transform_indices = @transform_0, window_bounds = array<i64: 1, 4, 16, 16>}, {pipeline_mode = #tpu.pipeline_mode<synchronous>, transform_indices = @transform_1, window_bounds = array<i64: 3, 64, 128>}, {pipeline_mode = #tpu.pipeline_mode<synchronous>, transform_indices = @transform_2, window_bounds = array<i64: 64, 128>}, {transform_indices = @transform_3, window_bounds = array<i64: 16, 128>}, {transform_indices = @transform_4, window_bounds = array<i64: 16, 128>}, {transform_indices = @transform_5, window_bounds = array<i64: 1, 4, 128>}]} {
    %c0 = arith.constant 0 : index
    %c0_0 = arith.constant 0 : index
    %c0_1 = arith.constant 0 : index
    %c0_2 = arith.constant 0 : index
    %0 = vector.load %arg1[%c0, %c0_0, %c0_1, %c0_2] : memref<1x4x16x16xf32, #tpu.memory_space<vmem>>, vector<1x4x16x16xf32>
    %1 = vector.shape_cast %0 : vector<1x4x16x16xf32> to vector<4x16x16xf32>
    %2 = vector.extract_strided_slice %1 {offsets = [0, 0, 0], sizes = [1, 16, 16], strides = [1, 1, 1]} : vector<4x16x16xf32> to vector<1x16x16xf32>
    %3 = vector.shape_cast %2 : vector<1x16x16xf32> to vector<16x16xf32>
    %4 = vector.extract_strided_slice %1 {offsets = [1, 0, 0], sizes = [1, 16, 16], strides = [1, 1, 1]} : vector<4x16x16xf32> to vector<1x16x16xf32>
    %5 = vector.shape_cast %4 : vector<1x16x16xf32> to vector<16x16xf32>
    %6 = vector.extract_strided_slice %1 {offsets = [2, 0, 0], sizes = [1, 16, 16], strides = [1, 1, 1]} : vector<4x16x16xf32> to vector<1x16x16xf32>
    %7 = vector.shape_cast %6 : vector<1x16x16xf32> to vector<16x16xf32>
    %8 = vector.extract_strided_slice %1 {offsets = [3, 0, 0], sizes = [1, 16, 16], strides = [1, 1, 1]} : vector<4x16x16xf32> to vector<1x16x16xf32>
    %9 = vector.shape_cast %8 : vector<1x16x16xf32> to vector<16x16xf32>
    %10 = tpu.concatenate %3, %5, %7, %9 in 1 : vector<16x16xf32>, vector<16x16xf32>, vector<16x16xf32>, vector<16x16xf32> -> vector<16x64xf32>
    %11 = arith.truncf %10 : vector<16x64xf32> to vector<16x64xbf16>
    %cst = arith.constant 0.000000e+00 : bf16
    %12 = vector.broadcast %cst : bf16 to vector<1x64xbf16>
    %13 = vector.extract_strided_slice %11 {offsets = [0, 0], sizes = [15, 64], strides = [1, 1]} : vector<16x64xbf16> to vector<15x64xbf16>
    %14 = tpu.concatenate %12, %13 in 0 : vector<1x64xbf16>, vector<15x64xbf16> -> vector<16x64xbf16>
    %15 = vector.extract_strided_slice %11 {offsets = [1, 0], sizes = [15, 64], strides = [1, 1]} : vector<16x64xbf16> to vector<15x64xbf16>
    %16 = tpu.concatenate %15, %12 in 0 : vector<15x64xbf16>, vector<1x64xbf16> -> vector<16x64xbf16>
    %c0_3 = arith.constant 0 : index
    %c0_4 = arith.constant 0 : index
    %c0_5 = arith.constant 0 : index
    %17 = vector.load %arg2[%c0_3, %c0_4, %c0_5] : memref<3x64x128xbf16, #tpu.memory_space<vmem>>, vector<1x64x128xbf16>
    %18 = vector.shape_cast %17 : vector<1x64x128xbf16> to vector<64x128xbf16>
    %cst_6 = arith.constant dense<0.000000e+00> : vector<16x128xf32>
    %19 = tpu.matmul %14, %18, %cst_6 {dimension_numbers = #tpu.dot_dimension_numbers<[1], [0], [0], [1], [0, 0, 1, 1], [], []>} : vector<16x64xbf16>, vector<64x128xbf16>, vector<16x128xf32> -> vector<16x128xf32>
    %c1 = arith.constant 1 : index
    %c0_7 = arith.constant 0 : index
    %c0_8 = arith.constant 0 : index
    %20 = vector.load %arg2[%c1, %c0_7, %c0_8] : memref<3x64x128xbf16, #tpu.memory_space<vmem>>, vector<1x64x128xbf16>
    %21 = vector.shape_cast %20 : vector<1x64x128xbf16> to vector<64x128xbf16>
    %cst_9 = arith.constant dense<0.000000e+00> : vector<16x128xf32>
    %22 = tpu.matmul %11, %21, %cst_9 {dimension_numbers = #tpu.dot_dimension_numbers<[1], [0], [0], [1], [0, 0, 1, 1], [], []>} : vector<16x64xbf16>, vector<64x128xbf16>, vector<16x128xf32> -> vector<16x128xf32>
    %23 = arith.addf %19, %22 : vector<16x128xf32>
    %c2 = arith.constant 2 : index
    %c0_10 = arith.constant 0 : index
    %c0_11 = arith.constant 0 : index
    %24 = vector.load %arg2[%c2, %c0_10, %c0_11] : memref<3x64x128xbf16, #tpu.memory_space<vmem>>, vector<1x64x128xbf16>
    %25 = vector.shape_cast %24 : vector<1x64x128xbf16> to vector<64x128xbf16>
    %cst_12 = arith.constant dense<0.000000e+00> : vector<16x128xf32>
    %26 = tpu.matmul %16, %25, %cst_12 {dimension_numbers = #tpu.dot_dimension_numbers<[1], [0], [0], [1], [0, 0, 1, 1], [], []>} : vector<16x64xbf16>, vector<64x128xbf16>, vector<16x128xf32> -> vector<16x128xf32>
    %27 = arith.addf %23, %26 : vector<16x128xf32>
    %28 = arith.truncf %27 : vector<16x128xf32> to vector<16x128xbf16>
    %c0_13 = arith.constant 0 : index
    %c0_14 = arith.constant 0 : index
    %29 = vector.load %arg4[%c0_13, %c0_14] : memref<16x128xbf16, #tpu.memory_space<vmem>>, vector<16x128xbf16>
    tpu.vector_store %arg4[%c0_13, %c0_14], %28 {strides = array<i32>} : memref<16x128xbf16, #tpu.memory_space<vmem>>, vector<16x128xbf16>,
    %c0_15 = arith.constant 0 : index
    %c0_16 = arith.constant 0 : index
    %30 = vector.load %arg3[%c0_15, %c0_16] : memref<64x128xbf16, #tpu.memory_space<vmem>>, vector<64x128xbf16>
    %cst_17 = arith.constant dense<0.000000e+00> : vector<16x128xf32>
    %31 = tpu.matmul %11, %30, %cst_17 {dimension_numbers = #tpu.dot_dimension_numbers<[1], [0], [0], [1], [0, 0, 1, 1], [], []>} : vector<16x64xbf16>, vector<64x128xbf16>, vector<16x128xf32> -> vector<16x128xf32>
    %32 = arith.truncf %31 : vector<16x128xf32> to vector<16x128xbf16>
    %c0_18 = arith.constant 0 : index
    %c0_19 = arith.constant 0 : index
    %33 = vector.load %arg5[%c0_18, %c0_19] : memref<16x128xbf16, #tpu.memory_space<vmem>>, vector<16x128xbf16>
    tpu.vector_store %arg5[%c0_18, %c0_19], %32 {strides = array<i32>} : memref<16x128xbf16, #tpu.memory_space<vmem>>, vector<16x128xbf16>,
    %34 = arith.extf %28 : vector<16x128xbf16> to vector<16x128xf32>
    %cst_20 = arith.constant dense<0.000000e+00> : vector<128xf32>
    %35 = vector.multi_reduction <add>, %34, %cst_20 [0] : vector<16x128xf32> to vector<128xf32>
    %36 = vector.shape_cast %35 : vector<128xf32> to vector<1x128xf32>
    %37 = arith.mulf %34, %34 : vector<16x128xf32>
    %cst_21 = arith.constant dense<0.000000e+00> : vector<128xf32>
    %38 = vector.multi_reduction <add>, %37, %cst_21 [0] : vector<16x128xf32> to vector<128xf32>
    %39 = vector.shape_cast %38 : vector<128xf32> to vector<1x128xf32>
    %40 = arith.extf %32 : vector<16x128xbf16> to vector<16x128xf32>
    %cst_22 = arith.constant dense<0.000000e+00> : vector<128xf32>
    %41 = vector.multi_reduction <add>, %40, %cst_22 [0] : vector<16x128xf32> to vector<128xf32>
    %42 = vector.shape_cast %41 : vector<128xf32> to vector<1x128xf32>
    %43 = arith.mulf %40, %40 : vector<16x128xf32>
    %cst_23 = arith.constant dense<0.000000e+00> : vector<128xf32>
    %44 = vector.multi_reduction <add>, %43, %cst_23 [0] : vector<16x128xf32> to vector<128xf32>
    %45 = vector.shape_cast %44 : vector<128xf32> to vector<1x128xf32>
    %46 = tpu.concatenate %36, %39, %42, %45 in 0 : vector<1x128xf32>, vector<1x128xf32>, vector<1x128xf32>, vector<1x128xf32> -> vector<4x128xf32>
    %47 = vector.shape_cast %46 : vector<4x128xf32> to vector<1x4x128xf32>
    %c0_24 = arith.constant 0 : index
    %c0_25 = arith.constant 0 : index
    %c0_26 = arith.constant 0 : index
    %48 = vector.load %arg6[%c0_24, %c0_25, %c0_26] : memref<1x4x128xf32, #tpu.memory_space<vmem>>, vector<1x4x128xf32>
    tpu.vector_store %arg6[%c0_24, %c0_25, %c0_26], %47 {strides = array<i32>} : memref<1x4x128xf32, #tpu.memory_space<vmem>>, vector<1x4x128xf32>,
    return
  }
  func.func @transform_0(%arg0: i32) -> (i32, i32, i32, i32) {
    %c0_i32 = arith.constant 0 : i32
    %c0_i32_0 = arith.constant 0 : i32
    %c0_i32_1 = arith.constant 0 : i32
    %c0_i32_2 = arith.constant 0 : i32
    return %arg0, %c0_i32, %c0_i32_0, %c0_i32_1 : i32, i32, i32, i32
  }
  func.func @transform_1(%arg0: i32) -> (i32, i32, i32) {
    %c0_i32 = arith.constant 0 : i32
    %c0_i32_0 = arith.constant 0 : i32
    %c0_i32_1 = arith.constant 0 : i32
    %c0_i32_2 = arith.constant 0 : i32
    return %c0_i32, %c0_i32_0, %c0_i32_1 : i32, i32, i32
  }
  func.func @transform_2(%arg0: i32) -> (i32, i32) {
    %c0_i32 = arith.constant 0 : i32
    %c0_i32_0 = arith.constant 0 : i32
    %c0_i32_1 = arith.constant 0 : i32
    return %c0_i32, %c0_i32_0 : i32, i32
  }
  func.func @transform_3(%arg0: i32) -> (i32, i32) {
    %c0_i32 = arith.constant 0 : i32
    %c0_i32_0 = arith.constant 0 : i32
    return %arg0, %c0_i32 : i32, i32
  }
  func.func @transform_4(%arg0: i32) -> (i32, i32) {
    %c0_i32 = arith.constant 0 : i32
    %c0_i32_0 = arith.constant 0 : i32
    return %arg0, %c0_i32 : i32, i32
  }
  func.func @transform_5(%arg0: i32) -> (i32, i32, i32) {
    %c0_i32 = arith.constant 0 : i32
    %c0_i32_0 = arith.constant 0 : i32
    %c0_i32_1 = arith.constant 0 : i32
    return %arg0, %c0_i32, %c0_i32_0 : i32, i32, i32
  }
}

</mosaic_0001>

<bundles_post_ra>
// kernel: tpu_custom_call.1
= control target key start
LH: loop header
LB: loop body
LE: loop exit
PB: predicated region body
PF: predicated region fallthrough
CT: control target
= control target key end

     0   :  { %11 = vsyncpa [#allocation3], 0  ;;  %s1808_s0 = inlined_call_operand.hbm [shape: f32[2,4,16,16], index: 0, kind: input, shape index: {}]   ;;  %s1809_s1 = inlined_call_operand.hbm [shape: bf16[3,64,128], index: 1, kind: input, shape index: {}]   ;;  %s1810_s2 = inlined_call_operand.hbm [shape: bf16[64,128], index: 2, kind: input, shape index: {}]   ;;  %s1811_s3 = inlined_call_operand.hbm [shape: bf16[32,128], index: 3, kind: output, shape index: {0}]   ;;  %s1812_s4 = inlined_call_operand.hbm [shape: bf16[32,128], index: 4, kind: output, shape index: {1}]   ;;  %s1813_s5 = inlined_call_operand.hbm [shape: f32[2,4,128], index: 5, kind: output, shape index: {2}]  }
   0x1   :  { %13 = vsyncpa [#allocation3 + $0x1], 0 }
   0x2   :  { %14 = vsyncpa [#allocation6], 0 }
   0x3   :  { %15 = vsyncpa [#allocation4], 0 }
   0x4   :  { %17 = vsyncpa [#allocation4 + $0x1], 0 }
   0x5   :  { %18 = vsyncpa [#allocation10], 0 }
   0x6   :  { %20 = vsyncpa [#allocation10 + $0x1], 0  ;;  %s1452_s18 = smov 0   ;;  %s1454_s19 = smov 0  }
   0x7   :  { %s1456_s20 = smov 0   ;;  %s1458_s21 = smov 0  }
   0x8 LB: > { %s1473_s22 = sadd.s32 4294967295, %s1403_s21   ;;  %s928_s23 = sadd.s32 4294967294, %s1403_s21   ;;  %s1403_s21 = sphi %s1458_s21, %s1833_s21   ;;  %s1399_s20 = sphi %s1456_s20, %s1832_s20   ;;  %s1395_s19 = sphi %s1454_s19, %s1831_s19   ;;  %s1391_s18 = sphi %s1452_s18, %s1830_s18  }
   0x9   : > { %p46_p0 = scmp.ne.s32.totalorder %s1395_s19, %s1391_s18  ;;  %p1814_p1 = scmp.eq.s32.totalorder %s1473_s22, 0 }
   0xa   : > { %p118_p3 = scmp.eq.s32.totalorder %s928_s23, 1  ;;  %p929_p5 = scmp.ge.s32.totalorder %s1403_s21, 1 }
   0xb   : > { %p1484_p4 = por %p1814_p1, %p46_p0  ;;  %p177_p7 = scmp.lt.s32.totalorder %s1403_s21, 3 }
   0xc   : > { %p1489_p6 = por %p118_p3, %p46_p0  ;;  %s1405_s27 = smov [#allocation5]  }
   0xd   : > { %s1817_s24 = scalar_select %p1484_p4, 1, 0 }
   0xe   : > { %s1818_s25 = scalar_select %p1489_p6, 1, 0 }
   0xf   : > { %p1494_p8 = pnand %p929_p5, %p177_p7  ;;  %s189_s28 = sshll.u32 %s1405_s27, 4  ;;  %s1498_s28 = int_to_ptr.vmem [resolvable:$true] %s189_s28 }
  0x10   : > { %s1406_s30 = smov [#allocation7]   ;;  %s1187_s9 = scalar_lea.hbm %s1809_s1, 1536 }
  0x11   : > { %p1084_p9 = pneg %p1494_p8  ;;  %s202_s6 = sshll.u32 %s1406_s30, 4  ;;  %s1509_s6 = int_to_ptr.vmem [resolvable:$true] %s202_s6 }
  0x12   : > { %p1188_p12 = scmp.ne.s32.totalorder %s1809_s1, %s1187_s9  ;;  %p1194_p5 = scmp.lt.u32.totalorder %s1187_s9, %s1809_s1 }
  0x13   : > { %p1505_p11 = pnand %p1084_p9, %p1814_p1 }
  0x15   : > { %p1189_p13 = pneg %p1505_p11 }
  0x17   : > { %p1190_p0 = pnand %p1189_p13, %p1188_p12 }
  0x19   : > { %p1191_p3 = pneg %p1190_p0 }
  0x1b   : > { %p1196_p7 = pnand %p1194_p5, %p1191_p3 }
  0x1d   : > { %1199 = shalt.err (!%p1196_p7)
}
  0x1e   : > { %s1200_s14 = scalar_lea.vmem %s1498_s28, 1536  ;;  %p1208_p2 = scmp.lt.s32.totalorder %s1498_s28, %s1498_s28 }
  0x1f   : > { %p1201_p9 = scmp.ne.s32.totalorder %s1498_s28, %s1200_s14  ;;  %p1209_p12 = scmp.lt.s32.totalorder %s1200_s14, %s1200_s14 }
  0x21   : > { %p1203_p10 = pnand %p1201_p9, %p1189_p13  ;;  %p1210_p0 = por %p1209_p12, %p1208_p2 }
  0x23   : > { %p1204_p1 = pneg %p1203_p10 }
  0x25   : > { %p1211_p6 = pnand %p1210_p0, %p1204_p1 }
  0x27   : > { %1214 = shalt.err (!%p1211_p6)
}
  0x28   : > { %s1407_s15 = smov 64   ;;  %s1408_s16 = smov 4  }
  0x29   : > { %1087 = dma.hbm_to_vmem [thread:$0]  (!%p1505_p11), %s1809_s1, 1536, %s1498_s28, [#allocation6], %s1407_s15, %s1407_s15, %s1408_s16  }
  0x2a   : > { %s1215_s8 = scalar_lea.hbm %s1810_s2, 512 }
  0x2b   : > { %p1216_p2 = scmp.ne.s32.totalorder %s1810_s2, %s1215_s8  ;;  %p1222_p10 = scmp.lt.u32.totalorder %s1215_s8, %s1810_s2 }
  0x2d   : > { %p1218_p1 = pnand %p1216_p2, %p1189_p13 }
  0x2f   : > { %p1219_p6 = pneg %p1218_p1 }
  0x31   : > { %p1224_p3 = pnand %p1222_p10, %p1219_p6 }
  0x33   : > { %1227 = shalt.err (!%p1224_p3)
}
  0x34   : > { %s1228_s28 = scalar_lea.vmem %s1509_s6, 512  ;;  %p1236_p12 = scmp.lt.s32.totalorder %s1509_s6, %s1509_s6 }
  0x35   : > { %p1229_p5 = scmp.ne.s32.totalorder %s1509_s6, %s1228_s28  ;;  %p1237_p0 = scmp.lt.s32.totalorder %s1228_s28, %s1228_s28 }
  0x37   : > { %p1231_p7 = pnand %p1229_p5, %p1189_p13  ;;  %p1238_p2 = por %p1237_p0, %p1236_p12 }
  0x39   : > { %p1232_p9 = pneg %p1231_p7 }
  0x3b   : > { %p1239_p1 = pnand %p1238_p2, %p1232_p9 }
  0x3d   : > { %1242 = shalt.err (!%p1239_p1)
}
  0x3e   : > { %1090 = dma.hbm_to_vmem [thread:$0]  (!%p1505_p11), %s1810_s2, 512, %s1509_s6, [#allocation6], %s1407_s15, %s1407_s15, %s1408_s16  }
  0x3f   : > { %s1564_s17 = sadd.s32 1, %s1403_s21   ;;  %s33_s29 = sadd.s32 1, %s1399_s20 }
  0x40   : > { %s30_s27 = ssub.s32 %s1403_s21, %s1564_s17  ;;  %p40_p13 = scmp.ne.s32.totalorder %s1399_s20, %s1395_s19 }
  0x41   : > { %p31_p6 = scmp.eq.s32.totalorder %s30_s27, 0  ;;  %p41_p10 = scmp.eq.s32.totalorder %s1403_s21, 0 }
  0x42   : > { %p1821_p3 = scmp.eq.s32.totalorder %s1473_s22, 1  ;;  %p1107_p7 = scmp.lt.s32.totalorder %s1403_s21, 2 }
  0x43   : > { %s1580_s7 = scalar_select %p31_p6, %s1399_s20, %s33_s29  }
  0x44   : > { %p1574_p5 = por %p1821_p3, %p40_p13  ;;  %p42_p9 = por %p41_p10, %p40_p13 }
  0x45   : > { %s216_s8 = sand.u32 1, %s1399_s20   ;;  %s977_s6 = sshll.u32 %s1403_s21, 10 }
  0x46   : > { %s1822_s30 = scalar_select %p1574_p5, 1, 0 }
  0x47   : > { %s933_s9 = sshll.u32 %s216_s8, 6  ;;  %s1587_s10 = scalar_lea.hbm %s1808_s0, %s977_s6 }
  0x48   : > { %s220_s11 = scalar_lea.vmem [#allocation2], %s933_s9  ;;  %p1591_p11 = pnand %p1107_p7, %p42_p9 }
  0x49   : > { %s227_s12 = sshll.u32 %s220_s11, 4  ;;  %s1595_s13 = scalar_lea.sflag [#allocation3], %s216_s8  ;;  %s1589_s12 = int_to_ptr.vmem [resolvable:$true] %s227_s12 }
  0x4a   : > { %s1243_s14 = scalar_lea.hbm %s1587_s10, 1024  ;;  %p1245_p0 = pneg %p1591_p11 }
  0x4b   : > { %p1244_p12 = scmp.ne.s32.totalorder %s1587_s10, %s1243_s14  ;;  %s1248_s9 = scalar_lea.hbm %s1808_s0, 2048 }
  0x4c   : > { %p1249_p13 = scmp.lt.u32.totalorder %s1587_s10, %s1808_s0  ;;  %p1250_p6 = scmp.lt.u32.totalorder %s1248_s9, %s1243_s14 }
  0x4d   : > { %p1246_p2 = pnand %p1245_p0, %p1244_p12  ;;  %p1252_p3 = scmp.lt.u32.totalorder %s1243_s14, %s1587_s10 }
  0x4e   : > { %p1251_p10 = por %p1250_p6, %p1249_p13 }
  0x4f   : > { %p1247_p1 = pneg %p1246_p2 }
  0x50   : > { %p1253_p7 = por %p1252_p3, %p1251_p10 }
  0x52   : > { %p1254_p9 = pnand %p1253_p7, %p1247_p1 }
  0x54   : > { %1257 = shalt.err (!%p1254_p9)
}
  0x55   : > { %s1258_s8 = scalar_lea.vmem %s1589_s12, 1024  ;;  %s1409_s16 = smov [#allocation2]  }
  0x56   : > { %p1259_p12 = scmp.ne.s32.totalorder %s1589_s12, %s1258_s8  ;;  %s1263_s11 = sshll.u32 %s1409_s16, 4  ;;  %s1264_s11 = int_to_ptr.vmem [resolvable:$false] %s1263_s11 }
  0x57   : > { %s1265_s29 = scalar_lea.vmem %s1264_s11, 2048  ;;  %p1266_p4 = scmp.lt.s32.totalorder %s1589_s12, %s1264_s11 }
  0x58   : > { %p1261_p2 = pnand %p1259_p12, %p1245_p0  ;;  %p1267_p13 = scmp.lt.s32.totalorder %s1265_s29, %s1258_s8 }
  0x5a   : > { %p1262_p5 = pneg %p1261_p2  ;;  %p1268_p6 = por %p1267_p13, %p1266_p4 }
  0x5c   : > { %p1269_p10 = pnand %p1268_p6, %p1262_p5 }
  0x5e   : > { %1272 = shalt.err (!%p1269_p10)
}
  0x5f   : > { %s1410_s14 = smov 128   ;;  %s1411_s27 = smov 8  }
  0x60   : > { %1094 = dma.hbm_to_vmem [thread:$0]  (!%p1591_p11), %s1587_s10, 1024, %s1589_s12, %s1595_s13, %s1410_s14, %s1410_s14, %s1411_s27  }
  0x61   : > { %239 = sbr.rel (%p1494_p8) target bundleno = 539 (0x21b), region = 32  ;;  %s1626_s9 = sand.u32 (!%p1494_p8), 1, %s1395_s19  }
  0x62   : > { %s937_s6 = sshll.u32 (!%p1494_p8), %s1626_s9, 6  ;;  %s242_s15 = scalar_lea.sflag (!%p1494_p8), [#allocation3], %s1626_s9 }
  0x63   : > { %s1630_s8 = scalar_lea.vmem (!%p1494_p8), [#allocation2], %s937_s6  ;;  %p1824_p4 = scmp.ne.s32.totalorder (!%p1494_p8), %s1817_s24, 0 }
  0x68   : > { %1374 = dma.done.wait (%p1824_p4), %s242_s15, 1024  }
  0x69   : > { %1376 = vsyncadd (%p1824_p4), %s242_s15, 4294966272  ;;  %p1825_p5 = scmp.eq.s32.totalorder %s1473_s22, 0 }
  0x6b   : > { %1378 = dma.done.wait (%p1825_p5), [#allocation6], 2048   ;;  %p1826_p8 = pmov %p1825_p5 }
  0x6c   : > { %v1412_v0 = vmov 0.0   ;;  %vm1413_vm0 = vmmov 0   ;;  %v295_v1 = vld [vmem:[%s1630_s8 + $0x10] sm:$0xff]  ;;  %v296_v2 = vld [vmem:[%s1630_s8 + $0x18] sm:$0xff]  ;;  %v297_v3 = vld [vmem:[%s1630_s8 + $0x20] sm:$0xff]  ;;  %s1414_s24 = smov 16  }
  0x6d   : > { %1380 = vsyncadd (%p1826_p8), [#allocation6], 4294965248  ;;  %1014 = vmatprep.subr.bf16.mxu1 %v1412_v0  ;;  %1026 = vmatprep.subr.bf16.mxu0 %v1412_v0  ;;  %v1156_v4 = vpack.i.bf16 %v296_v2, %v295_v1  ;;  %v298_v5 = vld [vmem:[%s1630_s8 + $0x28] sm:$0xff]  ;;  %v299_v6 = vld [vmem:[%s1630_s8 + $0x30] sm:$0xff]  ;;  %s1415_s26 = smov 48   ;;  %s1416_s10 = smov 32  }
  0x6e   : > { %1022 = vmatprep.mubr.msk.bf16.mxu1 %vm1413_vm0, %v1412_v0  ;;  %1034 = vmatprep.mubr.msk.bf16.mxu0 %vm1413_vm0, %v1412_v0  ;;  %v300_v7 = vld [vmem:[%s1630_s8 + $0x38] sm:$0xff]  ;;  %v1171_v9 = vld [vmem:[#allocation5 + $0x20] sm:$0xff]   ;;  %v1161_v10 = vpack.i.bf16 %v298_v5, %v297_v3  ;;  %v1172_v11 = vld [vmem:[#allocation5 + $0x28] sm:$0xff]   ;;  %vm325_vm1 = vcmask 130048   ;;  %vm328_vm2 = vcmask 261120   ;;  %vm331_vm3 = vcmask 392192  }
  0x6f   : > { %v1166_v8 = vpack.i.bf16 %v300_v7, %v299_v6  ;;  %1157 = vrot.lane.b32.xlu0 %v1156_v4, %s1414_s24  ;;  %1015 = vmatpush3.bf16.msra.mxu1 %v1171_v9  ;;  %v1173_v12 = vld [vmem:[#allocation5] sm:$0xff]   ;;  %v1175_v13 = vld [vmem:[#allocation5 + $0x8] sm:$0xff]   ;;  %v1174_v14 = vld [vmem:[#allocation5 + $0x30] sm:$0xff]   ;;  %vm395_vm4 = vcmask 523264   ;;  %vm343_vm5 = vcmask 1040384   ;;  %vm350_vm8 = vcmask 1047552  }
  0x70   : > { %1016 = vmatprep.subr.bf16.mxu1 %v1412_v0  ;;  %1027 = vmatpush3.bf16.msra.mxu0 %v1173_v12  ;;  %v1177_v15 = vld [vmem:[#allocation5 + $0x10] sm:$0xff]   ;;  %v1176_v16 = vld [vmem:[#allocation5 + $0x38] sm:$0xff]   ;;  %v293_v22 = vld [vmem:[%s1630_s8] sm:$0xff]  ;;  %vm344_vm6 = vsmask.f32 256  ;;  %s940_s12 = sshll.u32 %s1626_s9, 3 }
  0x71   : > { %1167 = vrot.lane.b32.xlu1 %v1166_v8, %s1415_s26  ;;  %1028 = vmatprep.subr.bf16.mxu0 %v1412_v0  ;;  %v1179_v17 = vld [vmem:[#allocation5 + $0x18] sm:$0xff]   ;;  %v294_v23 = vld [vmem:[%s1630_s8 + $0x8] sm:$0xff]  ;;  %v1178_v35 = vld [vmem:[#allocation7] sm:$0xff]   ;;  %vm351_vm9 = vsmask.f32 7424  ;;  %s282_s28 = scalar_lea.vmem [#allocation9], %s940_s12 }
  0x72   : > { %v1180_v38 = vld [vmem:[#allocation7 + $0x8] sm:$0xff]   ;;  %vm345_vm7 = vmand %vm343_vm5, %vm344_vm6  ;;  %v1181_v42 = vld [vmem:[#allocation5 + $0x40] sm:$0xff]   ;;  %s762_s13 = sshll.u32 %s282_s28, 4  ;;  %s727_s16 = sand.u32 1, %s1473_s22   ;;  %s1682_s13 = int_to_ptr.vmem [resolvable:$true] %s762_s13 }
  0x73   : > { %1162 = vrot.lane.b32.xlu0 %v1161_v10, %s1416_s10  ;;  %1017 = vmatpush3.bf16.msra.mxu1 %v1172_v11  ;;  %v1182_v43 = vld [vmem:[#allocation7 + $0x10] sm:$0xff]   ;;  %v1183_v45 = vld [vmem:[#allocation5 + $0x48] sm:$0xff]   ;;  %v1184_v46 = vld [vmem:[#allocation7 + $0x18] sm:$0xff]   ;;  %s982_s11 = sshll.u32 %s1473_s22, 7  ;;  %s1691_s6 = scalar_lea.sflag [#allocation10], %s727_s16 }
  0x74   : > { %1018 = vmatprep.subr.bf16.mxu1 %v1412_v0  ;;  %1029 = vmatpush3.bf16.msra.mxu0 %v1175_v13  ;;  %v1185_v47 = vld [vmem:[#allocation5 + $0x50] sm:$0xff]   ;;  %v1186_v49 = vld [vmem:[#allocation5 + $0x58] sm:$0xff]   ;;  %vm352_vm10 = vmand %vm350_vm8, %vm351_vm9  ;;  %s1689_s27 = scalar_lea.hbm %s1812_s4, %s982_s11  ;;  %s1273_s15 = scalar_lea.vmem %s1682_s13, 128 }
  0x75   : > { %1030 = vmatprep.subr.bf16.mxu0 %v1412_v0  ;;  %p1274_p11 = scmp.ne.s32.totalorder %s1682_s13, %s1273_s15  ;;  %p1827_p0 = scmp.ne.s32.totalorder %s1822_s30, 0 }
  0x76   : > { %s1417_s8 = smov [#allocation9]  }
  0x77   : > { %1019 = vmatpush3.bf16.msra.mxu1 %v1174_v14  ;;  %p1275_p1 = pnand %p1274_p11, %p1827_p0  ;;  %s1277_s24 = sshll.u32 %s1417_s8, 4  ;;  %s1278_s24 = int_to_ptr.vmem [resolvable:$false] %s1277_s24 }
  0x78   : > { %1020 = vmatprep.subr.bf16.mxu1 %v1412_v0  ;;  %1031 = vmatpush3.bf16.msra.mxu0 %v1177_v15  ;;  %s1279_s26 = scalar_lea.vmem %s1278_s24, 256  ;;  %p1280_p7 = scmp.lt.s32.totalorder %s1682_s13, %s1278_s24 }
  0x79   : > { %1032 = vmatprep.subr.bf16.mxu0 %v1412_v0  ;;  %p1276_p3 = pneg %p1275_p1  ;;  %p1281_p9 = scmp.lt.s32.totalorder %s1279_s26, %s1273_s15 }
  0x7b   : > { %1021 = vmatpush3.bf16.msra.mxu1 %v1176_v16  ;;  %p1282_p12 = por %p1281_p9, %p1280_p7 }
  0x7c   : > { %1050 = vmatprep.subr.bf16.mxu1 %v1412_v0  ;;  %1033 = vmatpush3.bf16.msra.mxu0 %v1179_v17 }
  0x7d   : > { %1038 = vmatprep.subr.bf16.mxu0 %v1412_v0  ;;  %p1283_p2 = pnand %p1282_p12, %p1276_p3 }
  0xe1   : > { %v1158_v18 = vpop.permute.xlu0 %1157 }
  0xe2   : > { %v1160_v20 = vunpack.i.h.bf16 %v1158_v18  ;;  %v1159_v21 = vunpack.i.l.bf16 %v1158_v18 }
  0xe3   : > { %v1168_v19 = vpop.permute.xlu1 %1167 }
  0xe4   : > { %v1170_v25 = vunpack.i.h.bf16 %v1168_v19  ;;  %v1169_v26 = vunpack.i.l.bf16 %v1168_v19  ;;  %v326_v29 = vsel %vm325_vm1, %v293_v22, %v1159_v21  ;;  %v327_v30 = vsel %vm325_vm1, %v294_v23, %v1160_v20 }
  0xe5   : > { %v1163_v24 = vpop.permute.xlu0 %1162 }
  0xe6   : > { %v1165_v27 = vunpack.i.h.bf16 %v1163_v24  ;;  %v1164_v28 = vunpack.i.l.bf16 %v1163_v24 }
  0xe8   : > { %v329_v31 = vsel %vm328_vm2, %v326_v29, %v1164_v28  ;;  %v330_v32 = vsel %vm328_vm2, %v327_v30, %v1165_v27 }
  0xe9   : > { %v332_v33 = vsel %vm331_vm3, %v329_v31, %v1169_v26  ;;  %v333_v34 = vsel %vm331_vm3, %v330_v32, %v1170_v25 }
  0xea   : > { %v334_v36 = vpack.c.bf16 %v333_v34, %v332_v33 }
  0xec   : > { %1023 = vmatmul.mubr.msk.bf16.vlgmr.msra.gmra.mrb[0].mxu1 %vm395_vm4, %v334_v36  ;;  %v336_v37 = vshrl.u32 %v334_v36, 16  ;;  %v339_v40 = vshll.u32 %v334_v36, 16 }
  0xed   : > { %1051 = vmatpush3.bf16.msra.mxu1 %v1178_v35  ;;  %1058 = vmatprep.mubr.msk.bf16.mxu1 %vm1413_vm0, %v1412_v0 }
  0xee   : > { %1052 = vmatprep.subr.bf16.mxu1 %v1412_v0  ;;  %v338_v39 = vrot.slane %v336_v37, 7  ;;  %v347_v48 = vrot.slane %v339_v40, 1 }
  0xf0   : > { %v341_v41 = vor.u32 %v339_v40, %v338_v39  ;;  %v348_v50 = vor.u32 %v347_v48, %v336_v37 }
  0xf1   : > { %1053 = vmatpush3.bf16.msra.mxu1 %v1180_v38 }
  0xf2   : > { %v346_v44 = vsel %vm345_vm7, 0, %v341_v41  ;;  %1054 = vmatprep.subr.bf16.mxu1 %v1412_v0  ;;  %v353_v51 = vsel %vm352_vm10, %v348_v50, 0 }
  0xf3   : > { %1035 = vmatmul.mubr.msk.bf16.vlgmr.msra.gmra.mrb[0].mxu0 %vm395_vm4, %v346_v44 }
  0xf4   : > { %1039 = vmatpush3.bf16.msra.mxu0 %v1181_v42  ;;  %1046 = vmatprep.mubr.msk.bf16.mxu0 %vm1413_vm0, %v1412_v0 }
  0xf5   : > { %1055 = vmatpush3.bf16.msra.mxu1 %v1182_v43  ;;  %1040 = vmatprep.subr.bf16.mxu0 %v1412_v0 }
  0xf6   : > { %1056 = vmatprep.subr.bf16.mxu1 %v1412_v0 }
  0xf8   : > { %1041 = vmatpush3.bf16.msra.mxu0 %v1183_v45 }
  0xf9   : > { %1057 = vmatpush3.bf16.msra.mxu1 %v1184_v46  ;;  %1042 = vmatprep.subr.bf16.mxu0 %v1412_v0 }
  0xfc   : > { %1043 = vmatpush3.bf16.msra.mxu0 %v1185_v47  ;;  %1059 = vmatmul.mubr.msk.bf16.vlgmr.msra.gmra.mrb[4].mxu1 %vm395_vm4, %v334_v36 }
  0xfd   : > { %1044 = vmatprep.subr.bf16.mxu0 %v1412_v0 }
 0x100   : > { %1045 = vmatpush3.bf16.msra.mxu0 %v1186_v49 }
 0x103   : > { %1047 = vmatmul.mubr.msk.bf16.vlgmr.msra.gmra.mrb[0].mxu0 %vm395_vm4, %v353_v51 }
 0x1bf   : > { %v432_v52 = vpop.f32.mrb[0].mxu1 }
 0x1c0   : > { %v1024_v53 = vpop.f32.mrb[1].mxu1 }
 0x1c1   : > { %v435_v54 = vpop.f32.mrb[2].mxu1 }
 0x1c2   : > { %v1025_v55 = vpop.f32.mrb[3].mxu1 }
 0x1cf   : > { %v662_v56 = vpop.f32.mrb[4].mxu1 }
 0x1d0   : > { %v1060_v57 = vpop.f32.mrb[5].mxu1 }
 0x1d1   : > { %v665_v58 = vpop.f32.mrb[6].mxu1 }
 0x1d2   : > { %v669_v59 = vpack.c.bf16 %v665_v58, %v662_v56  ;;  %v1061_v60 = vpop.f32.mrb[7].mxu1 }
 0x1d4   : > { %993 = vst [vmem:[%s282_s28] sm:$0xff] %v669_v59   ;;  %v697_v61 = vunpack.c.l.bf16 %v669_v59  ;;  %v698_v62 = vunpack.c.h.bf16 %v669_v59 }
 0x1d5   : > { %1286 = shalt.err (!%p1283_p2)
}
 0x1d6   : > { %s1287_s10 = scalar_lea.hbm %s1689_s27, 128  ;;  %s1291_s29 = scalar_lea.hbm %s1812_s4, 256 }
 0x1d7   : > { %p1288_p13 = scmp.ne.s32.totalorder %s1689_s27, %s1287_s10  ;;  %p1292_p4 = scmp.lt.u32.totalorder %s1689_s27, %s1812_s4 }
 0x1d8   : > { %p1293_p5 = scmp.lt.u32.totalorder %s1291_s29, %s1287_s10  ;;  %p1295_p11 = scmp.lt.u32.totalorder %s1287_s10, %s1689_s27 }
 0x1d9   : > { %p1289_p6 = pnand %p1288_p13, %p1827_p0 }
 0x1da   : > { %p1294_p8 = por %p1293_p5, %p1292_p4 }
 0x1db   : > { %p1290_p10 = pneg %p1289_p6 }
 0x1dc   : > { %p1296_p1 = por %p1295_p11, %p1294_p8 }
 0x1de   : > { %p1297_p3 = pnand %p1296_p1, %p1290_p10 }
 0x1e0   : > { %1300 = shalt.err (!%p1297_p3)
}
 0x1e1   : > { %s1418_s15 = smov 64   ;;  %s1419_s24 = smov 4   ;;  %v699_v63 = vadd.f32 %v698_v62, %v697_v61  ;;  %v706_v0 = vmul.f32 %v697_v61, %v697_v61  ;;  %v707_v1 = vmul.f32 %v698_v62, %v698_v62  ;;  %v577_v2 = vpop.f32.mrb[0].mxu0 }
 0x1e2   : > { %1079 = dma.vmem_to_hbm [thread:$0]  (%p1827_p0), %s1682_s13, 128, %s1689_s27, %s1691_s6, %s1418_s15, %s1418_s15, %s1419_s24   ;;  %v1062_v3 = vadd.f32 %v577_v2, %v432_v52  ;;  %v1048_v4 = vpop.f32.mrb[1].mxu0 }
 0x1e3   : > { %s275_s26 = scalar_lea.vmem [#allocation8], %s940_s12  ;;  %v708_v5 = vadd.f32 %v707_v1, %v706_v0  ;;  %v580_v6 = vpop.f32.mrb[2].mxu0  ;;  %v700_v9 = vrot.slane %v699_v63, 4  ;;  %s1727_s28 = scalar_lea.hbm %s1811_s3, %s982_s11 }
 0x1e4   : > { %s746_s10 = sshll.u32 %s275_s26, 4  ;;  %v1063_v7 = vadd.f32 %v580_v6, %v435_v54  ;;  %v1049_v8 = vpop.f32.mrb[3].mxu0  ;;  %s723_s12 = scalar_lea.sflag [#allocation4], %s1626_s9  ;;  %s1720_s10 = int_to_ptr.vmem [resolvable:$true] %s746_s10 }
 0x1e5   : > { %v709_v10 = vrot.slane %v708_v5, 4  ;;  %v701_v14 = vadd.f32 %v700_v9, %v699_v63  ;;  %s1301_s16 = scalar_lea.vmem %s1720_s10, 128  ;;  %s1420_s29 = smov [#allocation8]  }
 0x1e6   : > { %v586_v11 = vpack.c.bf16 %v1063_v7, %v1062_v3  ;;  %p1302_p7 = scmp.ne.s32.totalorder %s1720_s10, %s1301_s16  ;;  %s1305_s14 = sshll.u32 %s1420_s29, 4  ;;  %s1306_s14 = int_to_ptr.vmem [resolvable:$false] %s1305_s14 }
 0x1e7   : > { %s1307_s8 = scalar_lea.vmem %s1306_s14, 256  ;;  %p1308_p2 = scmp.lt.s32.totalorder %s1720_s10, %s1306_s14 }
 0x1e8   : > { %988 = vst [vmem:[%s275_s26] sm:$0xff] %v586_v11   ;;  %v679_v12 = vunpack.c.l.bf16 %v586_v11  ;;  %v680_v13 = vunpack.c.h.bf16 %v586_v11  ;;  %p1303_p9 = pnand %p1302_p7, %p1827_p0  ;;  %p1309_p13 = scmp.lt.s32.totalorder %s1307_s8, %s1301_s16 }
 0x1ea   : > { %p1304_p12 = pneg %p1303_p9  ;;  %p1310_p6 = por %p1309_p13, %p1308_p2 }
 0x1ec   : > { %p1311_p10 = pnand %p1310_p6, %p1304_p12 }
 0x1ee   : > { %1314 = shalt.err (!%p1311_p10)
}
 0x1ef   : > { %s1315_s11 = scalar_lea.hbm %s1727_s28, 128  ;;  %s1319_s27 = scalar_lea.hbm %s1811_s3, 256 }
 0x1f0   : > { %p1316_p4 = scmp.ne.s32.totalorder %s1727_s28, %s1315_s11  ;;  %p1320_p11 = scmp.lt.u32.totalorder %s1727_s28, %s1811_s3 }
 0x1f1   : > { %p1321_p1 = scmp.lt.u32.totalorder %s1319_s27, %s1315_s11  ;;  %p1323_p7 = scmp.lt.u32.totalorder %s1315_s11, %s1727_s28 }
 0x1f2   : > { %p1317_p5 = pnand %p1316_p4, %p1827_p0 }
 0x1f3   : > { %p1322_p3 = por %p1321_p1, %p1320_p11 }
 0x1f4   : > { %p1318_p8 = pneg %p1317_p5 }
 0x1f5   : > { %p1324_p9 = por %p1323_p7, %p1322_p3 }
 0x1f7   : > { %p1325_p12 = pnand %p1324_p9, %p1318_p8 }
 0x1f9   : > { %1328 = shalt.err (!%p1325_p12)
}
 0x1fa   : > { %1078 = dma.vmem_to_hbm [thread:$0]  (%p1827_p0), %s1720_s10, 128, %s1727_s28, %s723_s12, %s1418_s15, %s1418_s15, %s1419_s24   ;;  %v710_v15 = vadd.f32 %v709_v10, %v708_v5  ;;  %v681_v16 = vadd.f32 %v680_v13, %v679_v12  ;;  %v688_v17 = vmul.f32 %v679_v12, %v679_v12  ;;  %v689_v18 = vmul.f32 %v680_v13, %v680_v13 }
 0x1fb   : > { %v702_v21 = vrot.slane %v701_v14, 2  ;;  %s942_s16 = sshll.u32 %s1626_s9, 2  ;;  %vm717_vm11 = vcmask 1041408   ;;  %s974_s15 = sshll.u32 %s1473_s22, 6  ;;  %vm719_vm12 = vcmask 1042432  }
 0x1fc   : > { %v682_v19 = vrot.slane %v681_v16, 4  ;;  %v690_v20 = vadd.f32 %v689_v18, %v688_v17  ;;  %v711_v22 = vrot.slane %v710_v15, 2  ;;  %s289_s24 = scalar_lea.vmem [#allocation11], %s942_s16  ;;  %s1762_s12 = scalar_lea.hbm %s1813_s5, %s974_s15 }
 0x1fd   : > { %v703_v27 = vadd.f32 %v702_v21, %v701_v14  ;;  %s778_s10 = sshll.u32 %s289_s24, 4  ;;  %s1421_s8 = smov [#allocation11]   ;;  %s1764_s10 = int_to_ptr.vmem [resolvable:$true] %s778_s10 }
 0x1fe   : > { %v683_v23 = vadd.f32 %v682_v19, %v681_v16  ;;  %v691_v24 = vrot.slane %v690_v20, 4  ;;  %v712_v28 = vadd.f32 %v711_v22, %v710_v15  ;;  %s1329_s22 = scalar_lea.vmem %s1764_s10, 64  ;;  %s1333_s11 = sshll.u32 %s1421_s8, 4  ;;  %s1334_s11 = int_to_ptr.vmem [resolvable:$false] %s1333_s11 }
 0x1ff   : > { %v704_v33 = vrot.slane %v703_v27, 1  ;;  %p1330_p2 = scmp.ne.s32.totalorder %s1764_s10, %s1329_s22  ;;  %s1335_s26 = scalar_lea.vmem %s1334_s11, 128 }
 0x200   : > { %v684_v25 = vrot.slane %v683_v23, 2  ;;  %v692_v26 = vadd.f32 %v691_v24, %v690_v20  ;;  %v713_v34 = vrot.slane %v712_v28, 1  ;;  %p1336_p10 = scmp.lt.s32.totalorder %s1764_s10, %s1334_s11  ;;  %p1337_p4 = scmp.lt.s32.totalorder %s1335_s26, %s1329_s22 }
 0x201   : > { %v705_v38 = vadd.f32 %v704_v33, %v703_v27  ;;  %p1331_p13 = pnand %p1330_p2, %p1827_p0 }
 0x202   : > { %v685_v29 = vadd.f32 %v684_v25, %v683_v23  ;;  %v693_v30 = vrot.slane %v692_v26, 2  ;;  %v714_v39 = vadd.f32 %v713_v34, %v712_v28  ;;  %p1338_p5 = por %p1337_p4, %p1336_p10 }
 0x203   : > { %p1332_p6 = pneg %p1331_p13 }
 0x204   : > { %v686_v31 = vrot.slane %v685_v29, 1  ;;  %v694_v32 = vadd.f32 %v693_v30, %v692_v26 }
 0x205   : > { %p1339_p8 = pnand %p1338_p5, %p1332_p6 }
 0x206   : > { %v695_v35 = vrot.slane %v694_v32, 1  ;;  %v687_v36 = vadd.f32 %v686_v31, %v685_v29 }
 0x208   : > { %v696_v37 = vadd.f32 %v695_v35, %v694_v32 }
 0x20a   : > { %v716_v40 = vsel %vm343_vm5, %v687_v36, %v696_v37 }
 0x20b   : > { %v718_v41 = vsel %vm717_vm11, %v716_v40, %v705_v38 }
 0x20c   : > { %v720_v42 = vsel %vm719_vm12, %v718_v41, %v714_v39 }
 0x20d   : > { %721 = vst [vmem:[%s289_s24] sm:$0xf] %v720_v42 }
 0x20e   : > { %1342 = shalt.err (!%p1339_p8)
}
 0x20f   : > { %s1343_s13 = scalar_lea.hbm %s1762_s12, 64  ;;  %s1347_s14 = scalar_lea.hbm %s1813_s5, 128 }
 0x210   : > { %p1344_p11 = scmp.ne.s32.totalorder %s1762_s12, %s1343_s13  ;;  %p1348_p7 = scmp.lt.u32.totalorder %s1762_s12, %s1813_s5 }
 0x211   : > { %p1349_p9 = scmp.lt.u32.totalorder %s1347_s14, %s1343_s13  ;;  %p1351_p2 = scmp.lt.u32.totalorder %s1343_s13, %s1762_s12 }
 0x212   : > { %p1345_p1 = pnand %p1344_p11, %p1827_p0 }
 0x213   : > { %p1350_p12 = por %p1349_p9, %p1348_p7 }
 0x214   : > { %p1346_p3 = pneg %p1345_p1 }
 0x215   : > { %p1352_p13 = por %p1351_p2, %p1350_p12 }
 0x217   : > { %p1353_p6 = pnand %p1352_p13, %p1346_p3 }
 0x219   : > { %1356 = shalt.err (!%p1353_p6)
}
 0x21a   : > { %1080 = dma.vmem_to_hbm [thread:$0]  (%p1827_p0), %s1764_s10, 64, %s1762_s12, %s1691_s6  }
 0x21b PF: > { %s790_s24 = sand.u32 1, %s1391_s18   ;;  %p1828_p10 = scmp.ne.s32.totalorder %s1818_s25, 0 }
 0x21c   : > { %p1829_p4 = scmp.ge.s32.totalorder %s1403_s21, 2  ;;  %s791_s28 = scalar_lea.sflag [#allocation4], %s790_s24 }
 0x21e   : > { %p1096_p5 = pnand %p1829_p4, %p1828_p10 }
 0x220   : > { %1382 = dma.done.wait (!%p1096_p5), %s791_s28, 128  }
 0x221   : > { %1384 = vsyncadd (!%p1096_p5), %s791_s28, 4294967168  ;;  %s799_s9 = sand.u32 1, %s928_s23  }
 0x222   : > { %s800_s22 = scalar_lea.sflag [#allocation10], %s799_s9 }
 0x223   : > { %1386 = dma.done.wait (!%p1096_p5), %s800_s22, 192  }
 0x224   : > { %1388 = vsyncadd (!%p1096_p5), %s800_s22, 4294967104  ;;  %p23_p0 = scmp.ge.s32.totalorder %s1564_s17, 4   ;;  %s1830_s18 = smov %s1395_s19 }
 0x225   : > { %s1831_s19 = smov %s1399_s20  ;;  %s1832_s20 = smov %s1580_s7 }
 0x226   : > { %s1833_s21 = smov %s1564_s17  ;;  %25 = sbr.rel (!%p23_p0) target bundleno = 8 (0x8), region = 119 }
 0x22d   :  { %814 = vsyncpa [#allocation3], 1 }
 0x22e   :  { %816 = vsyncpa [#allocation3 + $0x1], 1 }
 0x22f   :  { %817 = vsyncpa [#allocation6], 1 }
 0x230   :  { %818 = vsyncpa [#allocation4], 1 }
 0x231   :  { %820 = vsyncpa [#allocation4 + $0x1], 1 }
 0x232   :  { %821 = vsyncpa [#allocation10], 1 }
 0x233   :  { %823 = vsyncpa [#allocation10 + $0x1], 1 }

</bundles_post_ra>
